<compile_context>
chip_gen: v7x
topology: tpu7x:2x2x1
jax: 0.10.0
libtpu: 0.0.40
codegen_flags: <defaults>
</compile_context>

<pallas_src>
import functools
import math

import jax
import jax.numpy as jnp
from jax.experimental import pallas as pl
from jax.experimental.pallas import tpu as pltpu

BN_EPS = 1e-5


# ---------------------------------------------------------------------------
# Parameter construction (mirrors creak_layer_mask / calculate_mask_index).
# ---------------------------------------------------------------------------
def calculate_mask_index(kernel_length_now, largest_kernel_length):
    right_zero = math.ceil((largest_kernel_length - 1) / 2) - math.ceil(
        (kernel_length_now - 1) / 2)
    left_zero = largest_kernel_length - kernel_length_now - right_zero
    return left_zero, left_zero + kernel_length_now


def build_masked_params(layer_parameter_list, key):
    """Masked conv weight / bias (weight * mask pre-applied), as in PyTorch."""
    k_max = layer_parameter_list[-1][-1]
    w_blocks, b_blocks = [], []
    for (cin, cout, k) in layer_parameter_list:
        key, kw, kb = jax.random.split(key, 3)
        bound = 1.0 / math.sqrt(cin * k)
        w_small = jax.random.uniform(kw, (cout, cin, k), minval=-bound,
                                     maxval=bound, dtype=jnp.float32)
        bias = jax.random.uniform(kb, (cout,), minval=-bound, maxval=bound,
                                  dtype=jnp.float32)
        ind_l, ind_r = calculate_mask_index(k, k_max)
        w_big = jnp.zeros((cout, cin, k_max), jnp.float32)
        w_big = w_big.at[:, :, ind_l:ind_r].set(w_small)
        w_blocks.append(w_big)
        b_blocks.append(bias)
    return (jnp.concatenate(w_blocks, axis=0),
            jnp.concatenate(b_blocks, axis=0), k_max)


# ---------------------------------------------------------------------------
# VMEM footprint model and tiling choice (generation aware).
# ---------------------------------------------------------------------------
def _round_up(x, m):
    return ((x + m - 1) // m) * m


def _phys_vmem_bytes(shape, dtype):
    """Physical VMEM footprint: last dim padded to 128 lanes, second-minor to
    the dtype sublane tile (8 for 4-byte dtypes, 16 for 2-byte)."""
    itemsize = jnp.dtype(dtype).itemsize
    sublane_tile = 8 * max(1, 4 // itemsize)
    if len(shape) == 1:
        shape = (1,) + tuple(shape)
    lanes = _round_up(int(shape[-1]), 128)
    subs = _round_up(int(shape[-2]), sublane_tile)
    lead = 1
    for d in shape[:-2]:
        lead *= int(d)
    return lead * subs * lanes * itemsize


def _vmem_capacity_bytes():
    try:
        return int(pltpu.get_tpu_info().vmem_capacity_bytes)
    except Exception:
        return 64 * 1024 * 1024  # conservative: v7x has the smallest VMEM


def _tile_footprint(block_n, n_pad, cin_pad, lp, cout, l, ck,
                    cdt, odt, conv_resident):
    fp = 0
    fp += 2 * _phys_vmem_bytes((block_n, cin_pad, lp), cdt)    # input, 2 buffers
    fp += 2 * _phys_vmem_bytes((block_n, cout, l), odt)        # output, 2 buffers
    fp += 2 * _phys_vmem_bytes((cout, ck), cdt)                # weight (resident)
    fp += 6 * _phys_vmem_bytes((cout, 1), jnp.float32)         # gamma/beta/stats
    if conv_resident:
        fp += _phys_vmem_bytes((n_pad, cout, l), jnp.float32)  # persistent conv
    # per-sample temporaries (im2col, conv accumulator) + compiler headroom
    fp += _phys_vmem_bytes((cin_pad, lp), cdt)
    fp += _phys_vmem_bytes((ck, l), cdt)
    fp += 3 * _phys_vmem_bytes((cout, l), jnp.float32)
    fp += 2 * 1024 * 1024
    return fp


def _pick_block_n(n, budget, cin_pad, lp, cout, l, ck, cdt, odt, conv_resident):
    def fits(bn):
        return _tile_footprint(bn, _round_up(n, bn), cin_pad, lp, cout, l, ck,
                               cdt, odt, conv_resident) <= budget

    if not fits(1):
        return 1
    cap = 1
    for bn in range(2, n + 1):
        if fits(bn):
            cap = bn
        else:
            break
    # Prefer an exact divisor of the batch (no batch padding) unless it would
    # shrink the tile by more than 2x.
    best_div = max(d for d in range(1, cap + 1) if n % d == 0)
    return best_div if best_div * 2 >= cap else cap


# ---------------------------------------------------------------------------
# Pallas kernel: two-phase (statistics / normalize) conv + BN + ReLU.
# ---------------------------------------------------------------------------
def _os_layer_kernel(xp_ref, w_ref, g_ref, beta_ref, o_ref,
                     sum_ref, sq_ref, conv_ref=None, *,
                     K, L, block_n, total_rows, apply_relu, conv_resident):
    # xp_ref   : (block_n, Cin_pad, Lp)  padded input tile   (compute dtype)
    # w_ref    : (Cout, K*Cin_pad)       folded conv weight  (compute dtype)
    # g_ref    : (Cout, 1) f32           BN gamma
    # beta_ref : (Cout, 1) f32           BN beta
    # o_ref    : (block_n, Cout, L)      output tile (NCW, L on lanes)
    # sum_ref  : (Cout, 1) f32           running per-channel sum
    # sq_ref   : (Cout, 1) f32           running per-channel sum of squares
    # conv_ref : (N_pad, Cout, L) f32    persistent conv activation (optional)
    p = pl.program_id(0)   # 0: conv + statistics, 1: normalize + store
    i = pl.program_id(1)   # batch tile index
    w = w_ref[...]

    def conv_sample(b):
        # One sample: im2col via lane-axis shifts (tap-major rows, sublane
        # aligned because Cin is padded to the sublane tile), one MXU matmul
        # with contraction K*Cin_pad.
        xb = xp_ref[b]                                            # (Cin_pad, Lp)
        lhs = jnp.concatenate([xb[:, k:k + L] for k in range(K)], axis=0)
        return jax.lax.dot_general(                               # (Cout, L) f32
            w, lhs, dimension_numbers=(((1,), (0,)), ((), ())),
            preferred_element_type=jnp.float32)

    def loop_over_tile(body):
        if block_n <= 8:                         # short fixed loop: unroll
            for b in range(block_n):
                body(b)
        else:
            def fori_body(b, carry):
                body(b)
                return carry
            jax.lax.fori_loop(0, block_n, fori_body, 0)

    @pl.when(p == 0)
    def _conv_and_stats():
        @pl.when(i == 0)
        def _init():
            sum_ref[...] = jnp.zeros(sum_ref.shape, sum_ref.dtype)
            sq_ref[...] = jnp.zeros(sq_ref.shape, sq_ref.dtype)

        def body(b):
            conv = conv_sample(b)
            if conv_resident:
                conv_ref[i * block_n + b] = conv
            sum_ref[...] += jnp.sum(conv, axis=-1, keepdims=True)
            sq_ref[...] += jnp.sum(conv * conv, axis=-1, keepdims=True)

        loop_over_tile(body)

    @pl.when(p == 1)
    def _normalize_and_store():
        # TODO(synk): one-pass E[x^2] - E[x]^2 in f32 can lose precision for
        # very large N*L; a mean-shifted / Welford combine would fix that.
        inv_cnt = 1.0 / float(total_rows)
        mean = sum_ref[...] * inv_cnt                    # (Cout, 1)
        var = sq_ref[...] * inv_cnt - mean * mean        # biased batch variance
        scale = jax.lax.rsqrt(var + BN_EPS) * g_ref[...]
        shift = beta_ref[...] - mean * scale

        def body(b):
            if conv_resident:
                conv = conv_ref[i * block_n + b]
            else:
                conv = conv_sample(b)
            y = conv * scale + shift
            if apply_relu:
                y = jnp.maximum(y, 0.0)
            o_ref[b] = y.astype(o_ref.dtype)

        loop_over_tile(body)


# ---------------------------------------------------------------------------
# Wrapper.
# ---------------------------------------------------------------------------
def os_cnn_layer(x_ncw, weight_oik, bias, gamma, beta, k_max,
                 relu_or_not_at_last_layer=True, *, block_n=None,
                 compute_dtype=jnp.bfloat16, out_dtype=jnp.float32):
    """Forward pass of build_layer_with_layer_parameter.

    x_ncw      : (N, C_in, L)      float32, PyTorch NCW layout
    weight_oik : (C_out, C_in, K)  masked conv weight (weight * mask)
    bias       : (C_out,)          accepted for API parity; a per-channel bias
                                   immediately followed by training-mode
                                   BatchNorm cancels exactly, so it is dropped.
    gamma,beta : (C_out,)          BatchNorm affine parameters
    returns    : (N, C_out, L)     PyTorch NCW layout, out_dtype

    compute_dtype: conv input/weight dtype.  bfloat16 (default) halves DMA
    bytes and doubles MXU rate on v6e/v7x; MXU accumulation, statistics and
    the normalization epilogue are always float32.  Use jnp.float32 for
    bit-accurate comparison against an f32 reference.
    """
    del bias  # cancels exactly through the training-mode BatchNorm that follows
    assert x_ncw.ndim == 3
    N, Cin, L = x_ncw.shape
    Cout = weight_oik.shape[0]
    K = int(k_max)
    assert weight_oik.shape == (Cout, Cin, K)

    pad_left = (K - 1) // 2
    pad_right = K // 2
    Lp = L + K - 1

    cdt = jnp.dtype(compute_dtype)
    odt = jnp.dtype(out_dtype)
    sublane_tile = 8 * max(1, 4 // cdt.itemsize)
    Cin_pad = _round_up(Cin, sublane_tile)
    CK = K * Cin_pad

    # --- generation-aware VMEM budget and tiling -----------------------------
    capacity = _vmem_capacity_bytes()
    budget = min(int(capacity * 0.60), 80 * 1024 * 1024)
    vmem_limit = min(int(capacity * 0.75), 96 * 1024 * 1024)

    conv_resident = (_phys_vmem_bytes((_round_up(N, 8), Cout, L), jnp.float32)
                     <= budget // 2)

    if block_n is None:
        block_n = _pick_block_n(N, budget, Cin_pad, Lp, Cout, L, CK,
                                cdt, odt, conv_resident)
    block_n = max(1, int(block_n))
    N_pad = _round_up(N, block_n)
    n_tiles = N_pad // block_n

    footprint = _tile_footprint(block_n, N_pad, Cin_pad, Lp, Cout, L, CK,
                                cdt, odt, conv_resident)
    vmem_limit = min(max(vmem_limit, int(footprint * 1.2)), capacity)

    # --- layout glue: a single jnp.pad (same-pad + Cin pad + batch pad) ------
    xp = jnp.pad(x_ncw, ((0, N_pad - N), (0, Cin_pad - Cin),
                         (pad_left, pad_right))).astype(cdt)  # (N_pad, Cin_pad, Lp)
    w2 = jnp.pad(weight_oik, ((0, 0), (0, Cin_pad - Cin), (0, 0)))
    w2 = jnp.transpose(w2, (0, 2, 1)).reshape(Cout, CK).astype(cdt)
    g2 = gamma.astype(jnp.float32).reshape(Cout, 1)
    b2 = beta.astype(jnp.float32).reshape(Cout, 1)

    kernel = functools.partial(
        _os_layer_kernel, K=K, L=L, block_n=block_n, total_rows=N * L,
        apply_relu=relu_or_not_at_last_layer, conv_resident=conv_resident)

    if conv_resident:
        # Phase 1 never reads the input: park its block so no re-DMA happens.
        in_idx = lambda p, i: (i * (1 - p) + (n_tiles - 1) * p, 0, 0)
    else:
        in_idx = lambda p, i: (i, 0, 0)

    scratch = [pltpu.VMEM((Cout, 1), jnp.float32),
               pltpu.VMEM((Cout, 1), jnp.float32)]
    if conv_resident:
        scratch.append(pltpu.VMEM((N_pad, Cout, L), jnp.float32))

    conv_flops = 2 * N_pad * L * Cout * CK
    cost = pl.CostEstimate(
        flops=int(conv_flops * (1 if conv_resident else 2) + 6 * N_pad * Cout * L),
        transcendentals=int(Cout * n_tiles),
        bytes_accessed=int(xp.size * cdt.itemsize * (1 if conv_resident else 2)
                           + w2.size * cdt.itemsize
                           + N_pad * Cout * L * odt.itemsize))

    grid_spec = pltpu.PrefetchScalarGridSpec(
        num_scalar_prefetch=0,
        grid=(2, n_tiles),                       # (phase, batch tile)
        in_specs=[
            pl.BlockSpec((block_n, Cin_pad, Lp), in_idx),
            pl.BlockSpec((Cout, CK), lambda p, i: (0, 0)),
            pl.BlockSpec((Cout, 1), lambda p, i: (0, 0)),
            pl.BlockSpec((Cout, 1), lambda p, i: (0, 0)),
        ],
        # Phase 0 parks the (unwritten) output block on index 0 so every output
        # block reaches HBM exactly once, written in phase 1.
        out_specs=pl.BlockSpec((block_n, Cout, L), lambda p, i: (p * i, 0, 0)),
        scratch_shapes=scratch,
    )

    out = pl.pallas_call(
        kernel,
        out_shape=jax.ShapeDtypeStruct((N_pad, Cout, L), out_dtype),
        grid_spec=grid_spec,
        compiler_params=pltpu.CompilerParams(
            # Both axes are sequential: phase 1 consumes the cross-tile BN
            # statistics.  (A v7x dual-core variant would need per-core partial
            # stats plus a cross-core combine.)
            dimension_semantics=("arbitrary", "arbitrary"),
            vmem_limit_bytes=int(vmem_limit)),
        cost_estimate=cost,
    )(xp, w2, g2, b2)

    return out if N_pad == N else out[:N]


# ---------------------------------------------------------------------------
# Pure-JAX reference (exact PyTorch math, including the bias).
# ---------------------------------------------------------------------------
def reference(x_ncw, weight_oik, bias, gamma, beta, k_max, relu=True):
    K = int(k_max)
    xp = jnp.pad(x_ncw, ((0, 0), (0, 0), ((K - 1) // 2, K // 2)))
    y = jax.lax.conv_general_dilated(
        xp, weight_oik, window_strides=(1,), padding="VALID",
        dimension_numbers=("NCH", "OIH", "NCH"))
    y = y + bias[None, :, None]
    mean = jnp.mean(y, axis=(0, 2), keepdims=True)
    var = jnp.mean((y - mean) ** 2, axis=(0, 2), keepdims=True)
    y = (y - mean) * jax.lax.rsqrt(var + BN_EPS)
    y = y * gamma[None, :, None] + beta[None, :, None]
    return jnp.maximum(y, 0.0) if relu else y


if __name__ == "__main__":
    # Small OS-CNN layer: 4 input channels, kernel sizes (3, 5, 7),
    # 8 output channels each -> 24 total output channels, K_max = 7.
    layer_parameters = [(4, 8, 3), (4, 8, 5), (4, 8, 7)]

    key = jax.random.PRNGKey(0)
    key, kx, kx3, kx12 = jax.random.split(key, 4)
    weight, bias, k_max = build_masked_params(layer_parameters, key)
    Cout = weight.shape[0]
    gamma = jnp.ones((Cout,), jnp.float32)   # nn.BatchNorm1d init
    beta = jnp.zeros((Cout,), jnp.float32)

    N, Cin, L = 2, 4, 16
    x = jax.random.normal(kx, (N, Cin, L), dtype=jnp.float32)

    ref_relu = reference(x, weight, bias, gamma, beta, k_max, relu=True)
    ref_lin = reference(x, weight, bias, gamma, beta, k_max, relu=False)

    # f32 compute: bit-accurate against the reference (single batch tile).
    out = jax.block_until_ready(os_cnn_layer(
        x, weight, bias, gamma, beta, k_max, True, compute_dtype=jnp.float32))
    assert out.shape == (N, Cout, L), out.shape
    assert jnp.allclose(out, ref_relu, atol=1e-4, rtol=1e-4), "relu mismatch"

    # Multi-tile path (grid = (2, 2)): exercises the cross-tile BN reduction.
    out_tiled = jax.block_until_ready(os_cnn_layer(
        x, weight, bias, gamma, beta, k_max, True,
        block_n=1, compute_dtype=jnp.float32))
    assert jnp.allclose(out_tiled, ref_relu, atol=1e-4, rtol=1e-4), \
        "tiled mismatch"

    # Ragged batch (N=3 with block_n=2): zero-padded batch rows must not
    # perturb the BN statistics and are sliced off afterwards.
    x3 = jax.random.normal(kx3, (3, Cin, L), dtype=jnp.float32)
    ref3 = reference(x3, weight, bias, gamma, beta, k_max, relu=True)
    out3 = jax.block_until_ready(os_cnn_layer(
        x3, weight, bias, gamma, beta, k_max, True,
        block_n=2, compute_dtype=jnp.float32))
    assert out3.shape == (3, Cout, L), out3.shape
    assert jnp.allclose(out3, ref3, atol=1e-4, rtol=1e-4), "ragged mismatch"

    # Larger batch tile (block_n = 12 > 8): exercises the in-kernel fori path.
    x12 = jax.random.normal(kx12, (12, Cin, L), dtype=jnp.float32)
    ref12 = reference(x12, weight, bias, gamma, beta, k_max, relu=True)
    out12 = jax.block_until_ready(os_cnn_layer(
        x12, weight, bias, gamma, beta, k_max, True, compute_dtype=jnp.float32))
    assert jnp.allclose(out12, ref12, atol=1e-4, rtol=1e-4), "fori mismatch"

    # No-ReLU (last-layer) path.
    out_lin = jax.block_until_ready(os_cnn_layer(
        x, weight, bias, gamma, beta, k_max, False, compute_dtype=jnp.float32))
    assert jnp.allclose(out_lin, ref_lin, atol=1e-4, rtol=1e-4), \
        "no-relu mismatch"

    # Default bf16 compute path (f32 accumulation / statistics): loose check.
    out_bf16 = jax.block_until_ready(os_cnn_layer(
        x, weight, bias, gamma, beta, k_max, True))
    assert float(jnp.max(jnp.abs(out_bf16 - ref_relu))) < 0.1, "bf16 mismatch"

    print("KERNEL_OK")
</pallas_src>

<mosaic_0001>
module attributes {stable_mosaic.version = 11 : i64} {
  func.func @_os_layer_kernel(%arg0: i32, %arg1: i32, %arg2: memref<2x8x22xf32, #tpu.memory_space<vmem>>, %arg3: memref<24x56xf32, #tpu.memory_space<vmem>>, %arg4: memref<24x1xf32, #tpu.memory_space<vmem>>, %arg5: memref<24x1xf32, #tpu.memory_space<vmem>>, %arg6: memref<2x24x16xf32, #tpu.memory_space<vmem>>, %arg7: memref<24x1xf32, #tpu.memory_space<vmem>>, %arg8: memref<24x1xf32, #tpu.memory_space<vmem>>, %arg9: memref<2x24x16xf32, #tpu.memory_space<vmem>>) attributes {dimension_semantics = [#tpu.dimension_semantics<arbitrary>, #tpu.dimension_semantics<arbitrary>], iteration_bounds = array<i64: 2, 1>, scalar_prefetch = 0 : i64, scratch_operands = 3 : i64, tpu.core_type = #tpu.core_type<tc>, window_params = [{transform_indices = @transform_0, window_bounds = array<i64: 2, 8, 22>}, {pipeline_mode = #tpu.pipeline_mode<synchronous>, transform_indices = @transform_1, window_bounds = array<i64: 24, 56>}, {pipeline_mode = #tpu.pipeline_mode<synchronous>, transform_indices = @transform_2, window_bounds = array<i64: 24, 1>}, {pipeline_mode = #tpu.pipeline_mode<synchronous>, transform_indices = @transform_3, window_bounds = array<i64: 24, 1>}, {transform_indices = @transform_4, window_bounds = array<i64: 2, 24, 16>}]} {
    %c0 = arith.constant 0 : index
    %c0_0 = arith.constant 0 : index
    %0 = vector.load %arg3[%c0, %c0_0] : memref<24x56xf32, #tpu.memory_space<vmem>>, vector<24x56xf32>
    %c0_i32 = arith.constant 0 : i32
    %1 = arith.cmpi eq, %arg0, %c0_i32 : i32
    %2 = arith.extui %1 : i1 to i32
    %c0_i32_1 = arith.constant 0 : i32
    %3 = arith.cmpi ne, %2, %c0_i32_1 : i32
    scf.if %3 {
      %c0_i32_3 = arith.constant 0 : i32
      %7 = arith.cmpi eq, %arg1, %c0_i32_3 : i32
      %8 = arith.extui %7 : i1 to i32
      %c0_i32_4 = arith.constant 0 : i32
      %9 = arith.cmpi ne, %8, %c0_i32_4 : i32
      scf.if %9 {
        %cst_38 = arith.constant 0.000000e+00 : f32
        %66 = vector.broadcast %cst_38 : f32 to vector<24x1xf32>
        %c0_39 = arith.constant 0 : index
        %c0_40 = arith.constant 0 : index
        %67 = vector.load %arg7[%c0_39, %c0_40] : memref<24x1xf32, #tpu.memory_space<vmem>>, vector<24x1xf32>
        tpu.vector_store %arg7[%c0_39, %c0_40], %66 {strides = array<i32>} : memref<24x1xf32, #tpu.memory_space<vmem>>, vector<24x1xf32>,
        %cst_41 = arith.constant 0.000000e+00 : f32
        %68 = vector.broadcast %cst_41 : f32 to vector<24x1xf32>
        %c0_42 = arith.constant 0 : index
        %c0_43 = arith.constant 0 : index
        %69 = vector.load %arg8[%c0_42, %c0_43] : memref<24x1xf32, #tpu.memory_space<vmem>>, vector<24x1xf32>
        tpu.vector_store %arg8[%c0_42, %c0_43], %68 {strides = array<i32>} : memref<24x1xf32, #tpu.memory_space<vmem>>, vector<24x1xf32>,
      } else {
      }
      %c0_5 = arith.constant 0 : index
      %c0_6 = arith.constant 0 : index
      %c0_7 = arith.constant 0 : index
      %10 = vector.load %arg2[%c0_5, %c0_6, %c0_7] : memref<2x8x22xf32, #tpu.memory_space<vmem>>, vector<1x8x22xf32>
      %11 = vector.shape_cast %10 : vector<1x8x22xf32> to vector<8x22xf32>
      %12 = vector.extract_strided_slice %11 {offsets = [0, 0], sizes = [8, 16], strides = [1, 1]} : vector<8x22xf32> to vector<8x16xf32>
      %13 = vector.extract_strided_slice %11 {offsets = [0, 1], sizes = [8, 16], strides = [1, 1]} : vector<8x22xf32> to vector<8x16xf32>
      %14 = vector.extract_strided_slice %11 {offsets = [0, 2], sizes = [8, 16], strides = [1, 1]} : vector<8x22xf32> to vector<8x16xf32>
      %15 = vector.extract_strided_slice %11 {offsets = [0, 3], sizes = [8, 16], strides = [1, 1]} : vector<8x22xf32> to vector<8x16xf32>
      %16 = vector.extract_strided_slice %11 {offsets = [0, 4], sizes = [8, 16], strides = [1, 1]} : vector<8x22xf32> to vector<8x16xf32>
      %17 = vector.extract_strided_slice %11 {offsets = [0, 5], sizes = [8, 16], strides = [1, 1]} : vector<8x22xf32> to vector<8x16xf32>
      %18 = vector.extract_strided_slice %11 {offsets = [0, 6], sizes = [8, 16], strides = [1, 1]} : vector<8x22xf32> to vector<8x16xf32>
      %19 = tpu.concatenate %12, %13, %14, %15, %16, %17, %18 in 0 : vector<8x16xf32>, vector<8x16xf32>, vector<8x16xf32>, vector<8x16xf32>, vector<8x16xf32>, vector<8x16xf32>, vector<8x16xf32> -> vector<56x16xf32>
      %cst = arith.constant dense<0.000000e+00> : vector<24x16xf32>
      %20 = tpu.matmul %0, %19, %cst {dimension_numbers = #tpu.dot_dimension_numbers<[1], [0], [0], [1], [0, 0, 1, 1], [], []>} : vector<24x56xf32>, vector<56x16xf32>, vector<24x16xf32> -> vector<24x16xf32>
      %c2_i32 = arith.constant 2 : i32
      %21 = arith.muli %arg1, %c2_i32 : i32
      %c0_i32_8 = arith.constant 0 : i32
      %22 = arith.addi %21, %c0_i32_8 : i32
      %23 = arith.index_cast %22 : i32 to index
      %c0_9 = arith.constant 0 : index
      %c0_10 = arith.constant 0 : index
      %24 = vector.load %arg9[%23, %c0_9, %c0_10] : memref<2x24x16xf32, #tpu.memory_space<vmem>>, vector<1x24x16xf32>
      %25 = vector.shape_cast %24 : vector<1x24x16xf32> to vector<24x16xf32>
      %26 = vector.shape_cast %20 : vector<24x16xf32> to vector<1x24x16xf32>
      tpu.vector_store %arg9[%23, %c0_9, %c0_10], %26 {strides = array<i32>} : memref<2x24x16xf32, #tpu.memory_space<vmem>>, vector<1x24x16xf32>,
      %c0_11 = arith.constant 0 : index
      %c0_12 = arith.constant 0 : index
      %27 = vector.load %arg7[%c0_11, %c0_12] : memref<24x1xf32, #tpu.memory_space<vmem>>, vector<24x1xf32>
      %cst_13 = arith.constant dense<0.000000e+00> : vector<24xf32>
      %28 = vector.multi_reduction <add>, %20, %cst_13 [1] : vector<24x16xf32> to vector<24xf32>
      %29 = vector.shape_cast %28 : vector<24xf32> to vector<24x1xf32>
      %30 = arith.addf %27, %29 : vector<24x1xf32>
      %c0_14 = arith.constant 0 : index
      %c0_15 = arith.constant 0 : index
      %31 = vector.load %arg7[%c0_14, %c0_15] : memref<24x1xf32, #tpu.memory_space<vmem>>, vector<24x1xf32>
      tpu.vector_store %arg7[%c0_14, %c0_15], %30 {strides = array<i32>} : memref<24x1xf32, #tpu.memory_space<vmem>>, vector<24x1xf32>,
      %c0_16 = arith.constant 0 : index
      %c0_17 = arith.constant 0 : index
      %32 = vector.load %arg8[%c0_16, %c0_17] : memref<24x1xf32, #tpu.memory_space<vmem>>, vector<24x1xf32>
      %33 = arith.mulf %20, %20 : vector<24x16xf32>
      %cst_18 = arith.constant dense<0.000000e+00> : vector<24xf32>
      %34 = vector.multi_reduction <add>, %33, %cst_18 [1] : vector<24x16xf32> to vector<24xf32>
      %35 = vector.shape_cast %34 : vector<24xf32> to vector<24x1xf32>
      %36 = arith.addf %32, %35 : vector<24x1xf32>
      %c0_19 = arith.constant 0 : index
      %c0_20 = arith.constant 0 : index
      %37 = vector.load %arg8[%c0_19, %c0_20] : memref<24x1xf32, #tpu.memory_space<vmem>>, vector<24x1xf32>
      tpu.vector_store %arg8[%c0_19, %c0_20], %36 {strides = array<i32>} : memref<24x1xf32, #tpu.memory_space<vmem>>, vector<24x1xf32>,
      %c1 = arith.constant 1 : index
      %c0_21 = arith.constant 0 : index
      %c0_22 = arith.constant 0 : index
      %38 = vector.load %arg2[%c1, %c0_21, %c0_22] : memref<2x8x22xf32, #tpu.memory_space<vmem>>, vector<1x8x22xf32>
      %39 = vector.shape_cast %38 : vector<1x8x22xf32> to vector<8x22xf32>
      %40 = vector.extract_strided_slice %39 {offsets = [0, 0], sizes = [8, 16], strides = [1, 1]} : vector<8x22xf32> to vector<8x16xf32>
      %41 = vector.extract_strided_slice %39 {offsets = [0, 1], sizes = [8, 16], strides = [1, 1]} : vector<8x22xf32> to vector<8x16xf32>
      %42 = vector.extract_strided_slice %39 {offsets = [0, 2], sizes = [8, 16], strides = [1, 1]} : vector<8x22xf32> to vector<8x16xf32>
      %43 = vector.extract_strided_slice %39 {offsets = [0, 3], sizes = [8, 16], strides = [1, 1]} : vector<8x22xf32> to vector<8x16xf32>
      %44 = vector.extract_strided_slice %39 {offsets = [0, 4], sizes = [8, 16], strides = [1, 1]} : vector<8x22xf32> to vector<8x16xf32>
      %45 = vector.extract_strided_slice %39 {offsets = [0, 5], sizes = [8, 16], strides = [1, 1]} : vector<8x22xf32> to vector<8x16xf32>
      %46 = vector.extract_strided_slice %39 {offsets = [0, 6], sizes = [8, 16], strides = [1, 1]} : vector<8x22xf32> to vector<8x16xf32>
      %47 = tpu.concatenate %40, %41, %42, %43, %44, %45, %46 in 0 : vector<8x16xf32>, vector<8x16xf32>, vector<8x16xf32>, vector<8x16xf32>, vector<8x16xf32>, vector<8x16xf32>, vector<8x16xf32> -> vector<56x16xf32>
      %cst_23 = arith.constant dense<0.000000e+00> : vector<24x16xf32>
      %48 = tpu.matmul %0, %47, %cst_23 {dimension_numbers = #tpu.dot_dimension_numbers<[1], [0], [0], [1], [0, 0, 1, 1], [], []>} : vector<24x56xf32>, vector<56x16xf32>, vector<24x16xf32> -> vector<24x16xf32>
      %c2_i32_24 = arith.constant 2 : i32
      %49 = arith.muli %arg1, %c2_i32_24 : i32
      %c1_i32_25 = arith.constant 1 : i32
      %50 = arith.addi %49, %c1_i32_25 : i32
      %51 = arith.index_cast %50 : i32 to index
      %c0_26 = arith.constant 0 : index
      %c0_27 = arith.constant 0 : index
      %52 = vector.load %arg9[%51, %c0_26, %c0_27] : memref<2x24x16xf32, #tpu.memory_space<vmem>>, vector<1x24x16xf32>
      %53 = vector.shape_cast %52 : vector<1x24x16xf32> to vector<24x16xf32>
      %54 = vector.shape_cast %48 : vector<24x16xf32> to vector<1x24x16xf32>
      tpu.vector_store %arg9[%51, %c0_26, %c0_27], %54 {strides = array<i32>} : memref<2x24x16xf32, #tpu.memory_space<vmem>>, vector<1x24x16xf32>,
      %c0_28 = arith.constant 0 : index
      %c0_29 = arith.constant 0 : index
      %55 = vector.load %arg7[%c0_28, %c0_29] : memref<24x1xf32, #tpu.memory_space<vmem>>, vector<24x1xf32>
      %cst_30 = arith.constant dense<0.000000e+00> : vector<24xf32>
      %56 = vector.multi_reduction <add>, %48, %cst_30 [1] : vector<24x16xf32> to vector<24xf32>
      %57 = vector.shape_cast %56 : vector<24xf32> to vector<24x1xf32>
      %58 = arith.addf %55, %57 : vector<24x1xf32>
      %c0_31 = arith.constant 0 : index
      %c0_32 = arith.constant 0 : index
      %59 = vector.load %arg7[%c0_31, %c0_32] : memref<24x1xf32, #tpu.memory_space<vmem>>, vector<24x1xf32>
      tpu.vector_store %arg7[%c0_31, %c0_32], %58 {strides = array<i32>} : memref<24x1xf32, #tpu.memory_space<vmem>>, vector<24x1xf32>,
      %c0_33 = arith.constant 0 : index
      %c0_34 = arith.constant 0 : index
      %60 = vector.load %arg8[%c0_33, %c0_34] : memref<24x1xf32, #tpu.memory_space<vmem>>, vector<24x1xf32>
      %61 = arith.mulf %48, %48 : vector<24x16xf32>
      %cst_35 = arith.constant dense<0.000000e+00> : vector<24xf32>
      %62 = vector.multi_reduction <add>, %61, %cst_35 [1] : vector<24x16xf32> to vector<24xf32>
      %63 = vector.shape_cast %62 : vector<24xf32> to vector<24x1xf32>
      %64 = arith.addf %60, %63 : vector<24x1xf32>
      %c0_36 = arith.constant 0 : index
      %c0_37 = arith.constant 0 : index
      %65 = vector.load %arg8[%c0_36, %c0_37] : memref<24x1xf32, #tpu.memory_space<vmem>>, vector<24x1xf32>
      tpu.vector_store %arg8[%c0_36, %c0_37], %64 {strides = array<i32>} : memref<24x1xf32, #tpu.memory_space<vmem>>, vector<24x1xf32>,
    } else {
    }
    %c1_i32 = arith.constant 1 : i32
    %4 = arith.cmpi eq, %arg0, %c1_i32 : i32
    %5 = arith.extui %4 : i1 to i32
    %c0_i32_2 = arith.constant 0 : i32
    %6 = arith.cmpi ne, %5, %c0_i32_2 : i32
    scf.if %6 {
      %c0_3 = arith.constant 0 : index
      %c0_4 = arith.constant 0 : index
      %7 = vector.load %arg7[%c0_3, %c0_4] : memref<24x1xf32, #tpu.memory_space<vmem>>, vector<24x1xf32>
      %cst = arith.constant 3.125000e-02 : f32
      %8 = vector.broadcast %cst : f32 to vector<24x1xf32>
      %9 = arith.mulf %7, %8 : vector<24x1xf32>
      %c0_5 = arith.constant 0 : index
      %c0_6 = arith.constant 0 : index
      %10 = vector.load %arg8[%c0_5, %c0_6] : memref<24x1xf32, #tpu.memory_space<vmem>>, vector<24x1xf32>
      %cst_7 = arith.constant 3.125000e-02 : f32
      %11 = vector.broadcast %cst_7 : f32 to vector<24x1xf32>
      %12 = arith.mulf %10, %11 : vector<24x1xf32>
      %13 = arith.mulf %9, %9 : vector<24x1xf32>
      %14 = arith.subf %12, %13 : vector<24x1xf32>
      %cst_8 = arith.constant 9.99999974E-6 : f32
      %15 = vector.broadcast %cst_8 : f32 to vector<24x1xf32>
      %16 = arith.addf %14, %15 : vector<24x1xf32>
      %17 = math.rsqrt %16 : vector<24x1xf32>
      %c0_9 = arith.constant 0 : index
      %c0_10 = arith.constant 0 : index
      %18 = vector.load %arg4[%c0_9, %c0_10] : memref<24x1xf32, #tpu.memory_space<vmem>>, vector<24x1xf32>
      %19 = arith.mulf %17, %18 : vector<24x1xf32>
      %c0_11 = arith.constant 0 : index
      %c0_12 = arith.constant 0 : index
      %20 = vector.load %arg5[%c0_11, %c0_12] : memref<24x1xf32, #tpu.memory_space<vmem>>, vector<24x1xf32>
      %21 = arith.mulf %9, %19 : vector<24x1xf32>
      %22 = arith.subf %20, %21 : vector<24x1xf32>
      %c2_i32 = arith.constant 2 : i32
      %23 = arith.muli %arg1, %c2_i32 : i32
      %c0_i32_13 = arith.constant 0 : i32
      %24 = arith.addi %23, %c0_i32_13 : i32
      %25 = arith.index_cast %24 : i32 to index
      %c0_14 = arith.constant 0 : index
      %c0_15 = arith.constant 0 : index
      %26 = vector.load %arg9[%25, %c0_14, %c0_15] : memref<2x24x16xf32, #tpu.memory_space<vmem>>, vector<1x24x16xf32>
      %27 = vector.shape_cast %26 : vector<1x24x16xf32> to vector<24x16xf32>
      %28 = vector.broadcast %19 : vector<24x1xf32> to vector<24x16xf32>
      %29 = arith.mulf %27, %28 : vector<24x16xf32>
      %30 = vector.broadcast %22 : vector<24x1xf32> to vector<24x16xf32>
      %31 = arith.addf %29, %30 : vector<24x16xf32>
      %cst_16 = arith.constant 0.000000e+00 : f32
      %32 = vector.broadcast %cst_16 : f32 to vector<24x16xf32>
      %33 = arith.maximumf %31, %32 : vector<24x16xf32>
      %c0_17 = arith.constant 0 : index
      %c0_18 = arith.constant 0 : index
      %c0_19 = arith.constant 0 : index
      %34 = vector.load %arg6[%c0_17, %c0_18, %c0_19] : memref<2x24x16xf32, #tpu.memory_space<vmem>>, vector<1x24x16xf32>
      %35 = vector.shape_cast %34 : vector<1x24x16xf32> to vector<24x16xf32>
      %36 = vector.shape_cast %33 : vector<24x16xf32> to vector<1x24x16xf32>
      tpu.vector_store %arg6[%c0_17, %c0_18, %c0_19], %36 {strides = array<i32>} : memref<2x24x16xf32, #tpu.memory_space<vmem>>, vector<1x24x16xf32>,
      %c2_i32_20 = arith.constant 2 : i32
      %37 = arith.muli %arg1, %c2_i32_20 : i32
      %c1_i32_21 = arith.constant 1 : i32
      %38 = arith.addi %37, %c1_i32_21 : i32
      %39 = arith.index_cast %38 : i32 to index
      %c0_22 = arith.constant 0 : index
      %c0_23 = arith.constant 0 : index
      %40 = vector.load %arg9[%39, %c0_22, %c0_23] : memref<2x24x16xf32, #tpu.memory_space<vmem>>, vector<1x24x16xf32>
      %41 = vector.shape_cast %40 : vector<1x24x16xf32> to vector<24x16xf32>
      %42 = vector.broadcast %19 : vector<24x1xf32> to vector<24x16xf32>
      %43 = arith.mulf %41, %42 : vector<24x16xf32>
      %44 = vector.broadcast %22 : vector<24x1xf32> to vector<24x16xf32>
      %45 = arith.addf %43, %44 : vector<24x16xf32>
      %cst_24 = arith.constant 0.000000e+00 : f32
      %46 = vector.broadcast %cst_24 : f32 to vector<24x16xf32>
      %47 = arith.maximumf %45, %46 : vector<24x16xf32>
      %c1 = arith.constant 1 : index
      %c0_25 = arith.constant 0 : index
      %c0_26 = arith.constant 0 : index
      %48 = vector.load %arg6[%c1, %c0_25, %c0_26] : memref<2x24x16xf32, #tpu.memory_space<vmem>>, vector<1x24x16xf32>
      %49 = vector.shape_cast %48 : vector<1x24x16xf32> to vector<24x16xf32>
      %50 = vector.shape_cast %47 : vector<24x16xf32> to vector<1x24x16xf32>
      tpu.vector_store %arg6[%c1, %c0_25, %c0_26], %50 {strides = array<i32>} : memref<2x24x16xf32, #tpu.memory_space<vmem>>, vector<1x24x16xf32>,
    } else {
    }
    return
  }
  func.func @transform_0(%arg0: i32, %arg1: i32) -> (i32, i32, i32) {
    %c1_i32 = arith.constant 1 : i32
    %0 = arith.subi %c1_i32, %arg0 : i32
    %1 = arith.muli %arg1, %0 : i32
    %c0_i32 = arith.constant 0 : i32
    %2 = arith.muli %c0_i32, %arg0 : i32
    %3 = arith.addi %1, %2 : i32
    %c0_i32_0 = arith.constant 0 : i32
    %c0_i32_1 = arith.constant 0 : i32
    %c0_i32_2 = arith.constant 0 : i32
    return %3, %c0_i32_0, %c0_i32_1 : i32, i32, i32
  }
  func.func @transform_1(%arg0: i32, %arg1: i32) -> (i32, i32) {
    %c0_i32 = arith.constant 0 : i32
    %c0_i32_0 = arith.constant 0 : i32
    %c0_i32_1 = arith.constant 0 : i32
    return %c0_i32, %c0_i32_0 : i32, i32
  }
  func.func @transform_2(%arg0: i32, %arg1: i32) -> (i32, i32) {
    %c0_i32 = arith.constant 0 : i32
    %c0_i32_0 = arith.constant 0 : i32
    %c0_i32_1 = arith.constant 0 : i32
    return %c0_i32, %c0_i32_0 : i32, i32
  }
  func.func @transform_3(%arg0: i32, %arg1: i32) -> (i32, i32) {
    %c0_i32 = arith.constant 0 : i32
    %c0_i32_0 = arith.constant 0 : i32
    %c0_i32_1 = arith.constant 0 : i32
    return %c0_i32, %c0_i32_0 : i32, i32
  }
  func.func @transform_4(%arg0: i32, %arg1: i32) -> (i32, i32, i32) {
    %0 = arith.muli %arg0, %arg1 : i32
    %c0_i32 = arith.constant 0 : i32
    %c0_i32_0 = arith.constant 0 : i32
    %c0_i32_1 = arith.constant 0 : i32
    return %0, %c0_i32, %c0_i32_0 : i32, i32, i32
  }
}

</mosaic_0001>

<bundles_post_ra>
// kernel: tpu_custom_call.1
= control target key start
LH: loop header
LB: loop body
LE: loop exit
PB: predicated region body
PF: predicated region fallthrough
CT: control target
= control target key end

     0   :  { %s961_s15 = smov 0   ;;  %s963_s16 = smov 0   ;;  %s1123_s0 = inlined_call_operand.vmem [shape: f32[2,8,22], index: 0, kind: input, shape index: {}]   ;;  %s1124_s1 = inlined_call_operand.vmem [shape: f32[24,56], index: 1, kind: input, shape index: {}]   ;;  %s1125_s2 = inlined_call_operand.vmem [shape: f32[24,1], index: 2, kind: input, shape index: {}]   ;;  %s1126_s3 = inlined_call_operand.vmem [shape: f32[24,1], index: 3, kind: input, shape index: {}]   ;;  %s1127_s4 = inlined_call_operand.vmem [shape: f32[2,24,16], index: 4, kind: output, shape index: {}]  }
   0x1   :  { %s965_s17 = smov 0  }
   0x2 LB: > { %s26_s18 = sadd.s32 1, %s920_s16  ;;  %p753_p0 = scmp.ge.s32.totalorder %s924_s17, 1  ;;  %s924_s17 = sphi %s965_s17, %s14_s17   ;;  %s920_s16 = sphi %s963_s16, %s1129_s16   ;;  %s916_s15 = sphi %s961_s15, %s1128_s15  }
   0x3   : > { %p28_p1 = scmp.ge.s32.totalorder %s26_s18, 2  ;;  %p185_p2 = scmp.lt.s32.totalorder %s924_s17, 3 }
   0x5   : > { %s1131_s18 = smov (%p28_p1, %s26_s18), 0  ;;  %p186_p3 = pnand %p753_p0, %p185_p2 }
   0x6   : > { %v984_v0 = vld [vmem:[%s1124_s1] sm:$0xff] (!%p186_p3)  ;;  %v989_v1 = vld [vmem:[%s1124_s1 + $0x8] sm:$0xff] (!%p186_p3)  ;;  %v994_v2 = vld [vmem:[%s1124_s1 + $0x10] sm:$0xff] (!%p186_p3)  ;;  %p754_p4 = scmp.ne.s32.totalorder (!%p186_p3), %s916_s15, 0 }
   0x7   : > { %189 = sbr.rel (%p186_p3) target bundleno = 696 (0x2b8), region = 36 }
   0xe   : > { %240 = sbr.rel (%p754_p4) target bundleno = 527 (0x20f), region = 40  ;;  %v252_v3 = vld [vmem:[%s1123_s0] sm:$0xff] (!%p754_p4)  ;;  %s926_s27 = smov (!%p754_p4), 127   ;;  %v928_v4 = vmov (!%p754_p4), 0.0|0.0   ;;  %vm929_vm0 = vmmov (!%p754_p4), 0   ;;  %v930_v5 = vmov (!%p754_p4), 0.0  }
   0xf   : > { %254 = vrot.lane.b32.xlu0 (!%p754_p4), %v252_v3, %s926_s27  ;;  %s927_s28 = smov (!%p754_p4), 125   ;;  %842 = vmatprep.subr.bf16.mxu0 (!%p754_p4), %v928_v4  ;;  %s931_s29 = smov (!%p754_p4), 126   ;;  %v758_v6 = vld [vmem:[%s1123_s0 + $0x8] sm:$0xff] (!%p754_p4)  ;;  %vm272_vm1 = vcmask (!%p754_p4), 457728   ;;  %vm365_vm2 = vcmask (!%p754_p4), 130048   ;;  %vm245_vm3 = vcmask (!%p754_p4), 7168  }
  0x10   : > { %260 = vrot.lane.b32.xlu1 (!%p754_p4), %v252_v3, %s927_s28  ;;  %851 = vmatprep.subr.bf16.mxu1 (!%p754_p4), %v928_v4  ;;  %s932_s30 = smov (!%p754_p4), 124   ;;  %s933_s7 = smov (!%p754_p4), 123   ;;  %246 = vst.msk [vmem:[#allocation2] sm:$0xff] (!%p754_p4), %vm245_vm3, %v930_v5  ;;  %247 = vst.msk [vmem:[#allocation2 + $0x8] sm:$0xff] (!%p754_p4), %vm245_vm3, %v930_v5 }
  0x11   : > { %810 = vmatprep.mubr.msk.f32.mxu0 (!%p754_p4), %vm929_vm0, %v930_v5  ;;  %833 = vmatprep.mubr.msk.f32.mxu1 (!%p754_p4), %vm929_vm0, %v930_v5  ;;  %s934_s8 = smov (!%p754_p4), 122   ;;  %248 = vst.msk [vmem:[#allocation2 + $0x10] sm:$0xff] (!%p754_p4), %vm245_vm3, %v930_v5  ;;  %249 = vst.msk [vmem:[#allocation3] sm:$0xff] (!%p754_p4), %vm245_vm3, %v930_v5 }
  0x12   : > { %250 = vst.msk [vmem:[#allocation3 + $0x8] sm:$0xff] (!%p754_p4), %vm245_vm3, %v930_v5  ;;  %251 = vst.msk [vmem:[#allocation3 + $0x10] sm:$0xff] (!%p754_p4), %vm245_vm3, %v930_v5 }
  0x13   : > { %257 = vrot.lane.b32.xlu0 (!%p754_p4), %v252_v3, %s931_s29 }
  0x14   : > { %263 = vrot.lane.b32.xlu1 (!%p754_p4), %v252_v3, %s932_s30 }
  0x17   : > { %266 = vrot.lane.b32.xlu0 %v252_v3, %s933_s7  ;;  %v369_v55 = vld [vmem:[#allocation2] sm:$0xff]  ;;  %v370_v59 = vld [vmem:[#allocation2 + $0x8] sm:$0xff] }
  0x18   : > { %412 = vrot.lane.b32.xlu1 %v758_v6, %s926_s27  ;;  %v388_v58 = vld [vmem:[#allocation3] sm:$0xff] }
  0x1b   : > { %269 = vrot.lane.b32.xlu0 %v252_v3, %s934_s8 }
  0x1c   : > { %415 = vrot.lane.b32.xlu1 %v758_v6, %s931_s29 }
  0x1f   : > { %418 = vrot.lane.b32.xlu0 %v758_v6, %s927_s28 }
  0x20   : > { %421 = vrot.lane.b32.xlu1 %v758_v6, %s932_s30 }
  0x23   : > { %424 = vrot.lane.b32.xlu0 %v758_v6, %s933_s7 }
  0x24   : > { %427 = vrot.lane.b32.xlu1 %v758_v6, %s934_s8 }
  0x81   : > { %v255_v7 = vpop.permute.xlu0 %254 }
  0x82   : > { %v261_v8 = vpop.permute.xlu1 %260  ;;  %v843_v9 = vpack.c.bf16 %v255_v7, %v252_v3 }
  0x84   : > { %844 = vmatpush3.bf16.msra.mxu0 %v843_v9 }
  0x85   : > { %v258_v10 = vpop.permute.xlu0 %257  ;;  %845 = vmatprep.subr.bf16.mxu0 %v928_v4 }
  0x86   : > { %v264_v11 = vpop.permute.xlu1 %263  ;;  %v846_v12 = vpack.c.bf16 %v261_v8, %v258_v10 }
  0x88   : > { %847 = vmatpush3.bf16.msra.mxu0 %v846_v12 }
  0x89   : > { %v267_v13 = vpop.permute.xlu0 %266  ;;  %848 = vmatprep.subr.bf16.mxu0 %v928_v4 }
  0x8a   : > { %v413_v14 = vpop.permute.xlu1 %412  ;;  %v849_v15 = vpack.c.bf16 %v267_v13, %v264_v11 }
  0x8b   : > { %v852_v16 = vpack.c.bf16 %v413_v14, %v758_v6  ;;  %v390_v6 = vld [vmem:[#allocation3 + $0x10] sm:$0xff] }
  0x8c   : > { %850 = vmatpush3.bf16.msra.mxu0 %v849_v15 }
  0x8d   : > { %853 = vmatpush3.bf16.msra.mxu1 %v852_v16  ;;  %v270_v17 = vpop.permute.xlu0 %269  ;;  %808 = vmatprep.subr.mxu0 %v930_v5 }
  0x8e   : > { %v416_v18 = vpop.permute.xlu1 %415  ;;  %854 = vmatprep.subr.bf16.mxu1 %v928_v4 }
  0x90   : > { %809 = vmatpush3.msra.mxu0 %v270_v17 }
  0x91   : > { %v419_v19 = vpop.permute.xlu0 %418  ;;  %811 = vmatmul.mubr.msk.f32.vlgmr.msra.gmra.mrb[0].mxu0 %vm272_vm1, %v984_v0 }
  0x92   : > { %v855_v20 = vpack.c.bf16 %v419_v19, %v416_v18  ;;  %813 = vmatprep.mubr.msk.f32.mxu0 %vm929_vm0, %v930_v5  ;;  %v422_v21 = vpop.permute.xlu1 %421 }
  0x94   : > { %856 = vmatpush3.bf16.msra.mxu1 %v855_v20 }
  0x95   : > { %v425_v22 = vpop.permute.xlu0 %424  ;;  %814 = vmatmul.mubr.msk.f32.gmra.mrb[2].mxu0 %vm272_vm1, %v989_v1  ;;  %857 = vmatprep.subr.bf16.mxu1 %v928_v4 }
  0x96   : > { %v858_v23 = vpack.c.bf16 %v425_v22, %v422_v21  ;;  %816 = vmatprep.mubr.msk.f32.mxu0 %vm929_vm0, %v930_v5  ;;  %v428_v24 = vpop.permute.xlu1 %427 }
  0x98   : > { %859 = vmatpush3.bf16.msra.mxu1 %v858_v23 }
  0x99   : > { %817 = vmatmul.mubr.msk.f32.gmra.mrb[4].mxu0 %vm272_vm1, %v994_v2  ;;  %831 = vmatprep.subr.mxu1 %v930_v5 }
  0x9c   : > { %832 = vmatpush3.msra.mxu1 %v428_v24 }
  0x9d   : > { %834 = vmatmul.mubr.msk.f32.vlgmr.msra.gmra.mrb[0].mxu1 %vm272_vm1, %v984_v0  ;;  %v389_v0 = vld [vmem:[#allocation3 + $0x8] sm:$0xff] }
  0x9e   : > { %836 = vmatprep.mubr.msk.f32.mxu1 %vm929_vm0, %v930_v5 }
  0xa1   : > { %837 = vmatmul.mubr.msk.f32.gmra.mrb[2].mxu1 %vm272_vm1, %v989_v1  ;;  %v371_v1 = vld [vmem:[#allocation2 + $0x10] sm:$0xff] }
  0xa2   : > { %839 = vmatprep.mubr.msk.f32.mxu1 %vm929_vm0, %v930_v5 }
  0xa5   : > { %840 = vmatmul.mubr.msk.f32.gmra.mrb[4].mxu1 %vm272_vm1, %v994_v2 }
 0x164   : > { %v348_v25 = vpop.f32.mrb[0].mxu0 }
 0x165   : > { %366 = vst.msk [vmem:[#allocation4] sm:$0xff] %vm365_vm2, %v348_v25  ;;  %v812_v26 = vpop.f32.mrb[1].mxu0  ;;  %v372_v27 = vsel %vm365_vm2, %v348_v25, 0.0  ;;  %v391_v28 = vmul.f32 %v348_v25, %v348_v25 }
 0x166   : > { %373 = vadd.xlane.f32.xlu0 %v372_v27 }
 0x167   : > { %v394_v31 = vsel %vm365_vm2, %v391_v28, 0.0 }
 0x168   : > { %v353_v29 = vpop.f32.mrb[2].mxu0 }
 0x169   : > { %367 = vst.msk [vmem:[#allocation4 + $0x8] sm:$0xff] %vm365_vm2, %v353_v29  ;;  %v815_v30 = vpop.f32.mrb[3].mxu0  ;;  %v375_v32 = vsel %vm365_vm2, %v353_v29, 0.0  ;;  %v392_v33 = vmul.f32 %v353_v29, %v353_v29 }
 0x16a   : > { %395 = vadd.xlane.f32.xlu0 %v394_v31  ;;  %376 = vadd.xlane.f32.xlu1 %v375_v32 }
 0x16b   : > { %v397_v36 = vsel %vm365_vm2, %v392_v33, 0.0 }
 0x16c   : > { %v358_v34 = vpop.f32.mrb[4].mxu0 }
 0x16d   : > { %368 = vst.msk [vmem:[#allocation4 + $0x10] sm:$0xff] %vm365_vm2, %v358_v34  ;;  %v818_v35 = vpop.f32.mrb[5].mxu0  ;;  %v378_v37 = vsel %vm365_vm2, %v358_v34, 0.0  ;;  %v393_v38 = vmul.f32 %v358_v34, %v358_v34 }
 0x16e   : > { %398 = vadd.xlane.f32.xlu1 %v397_v36  ;;  %379 = vadd.xlane.f32.xlu0 %v378_v37 }
 0x16f   : > { %v400_v42 = vsel %vm365_vm2, %v393_v38, 0.0 }
 0x170   : > { %v496_v39 = vpop.f32.mrb[0].mxu1 }
 0x171   : > { %762 = vst.msk [vmem:[#allocation4 + $0x18] sm:$0xff] %vm365_vm2, %v496_v39  ;;  %v835_v40 = vpop.f32.mrb[1].mxu1  ;;  %v519_v41 = vsel %vm365_vm2, %v496_v39, 0.0  ;;  %v537_v46 = vmul.f32 %v496_v39, %v496_v39 }
 0x172   : > { %520 = vadd.xlane.f32.xlu1 %v519_v41  ;;  %401 = vadd.xlane.f32.xlu0 %v400_v42 }
 0x173   : > { %v540_v50 = vsel %vm365_vm2, %v537_v46, 0.0 }
 0x174   : > { %v501_v43 = vpop.f32.mrb[2].mxu1 }
 0x175   : > { %763 = vst.msk [vmem:[#allocation4 + $0x20] sm:$0xff] %vm365_vm2, %v501_v43  ;;  %v838_v44 = vpop.f32.mrb[3].mxu1  ;;  %v522_v45 = vsel %vm365_vm2, %v501_v43, 0.0  ;;  %v538_v51 = vmul.f32 %v501_v43, %v501_v43 }
 0x176   : > { %523 = vadd.xlane.f32.xlu0 %v522_v45 }
 0x177   : > { %v543_v53 = vsel %vm365_vm2, %v538_v51, 0.0 }
 0x178   : > { %v506_v47 = vpop.f32.mrb[4].mxu1 }
 0x179   : > { %764 = vst.msk [vmem:[#allocation4 + $0x28] sm:$0xff] %vm365_vm2, %v506_v47  ;;  %v841_v48 = vpop.f32.mrb[5].mxu1  ;;  %v525_v49 = vsel %vm365_vm2, %v506_v47, 0.0  ;;  %v539_v52 = vmul.f32 %v506_v47, %v506_v47 }
 0x17a   : > { %526 = vadd.xlane.f32.xlu1 %v525_v49  ;;  %541 = vadd.xlane.f32.xlu0 %v540_v50 }
 0x17b   : > { %v546_v54 = vsel %vm365_vm2, %v539_v52, 0.0 }
 0x17e   : > { %544 = vadd.xlane.f32.xlu1 %v543_v53  ;;  %547 = vadd.xlane.f32.xlu0 %v546_v54 }
 0x1f3   : > { %v374_v56 = vpop.xlane.xlu0 %373 }
 0x1f4   : > { %v381_v57 = vadd.f32 %v374_v56, %v369_v55 }
 0x1f6   : > { %385 = vst.msk [vmem:[#allocation2] sm:$0xff] %vm245_vm3, %v381_v57 }
 0x1f7   : > { %v396_v60 = vpop.xlane.xlu0 %395  ;;  %v377_v61 = vpop.xlane.xlu1 %376 }
 0x1f8   : > { %v403_v62 = vadd.f32 %v396_v60, %v388_v58  ;;  %v382_v63 = vadd.f32 %v377_v61, %v370_v59 }
 0x1fa   : > { %406 = vst.msk [vmem:[#allocation3] sm:$0xff] %vm245_vm3, %v403_v62  ;;  %386 = vst.msk [vmem:[#allocation2 + $0x8] sm:$0xff] %vm245_vm3, %v382_v63 }
 0x1fb   : > { %v399_v2 = vpop.xlane.xlu1 %398  ;;  %v380_v3 = vpop.xlane.xlu0 %379 }
 0x1fc   : > { %v404_v4 = vadd.f32 %v399_v2, %v389_v0  ;;  %v383_v5 = vadd.f32 %v380_v3, %v371_v1 }
 0x1fd   : > { %v516_v8 = vld [vmem:[#allocation2] sm:$0xff] }
 0x1fe   : > { %407 = vst.msk [vmem:[#allocation3 + $0x8] sm:$0xff] %vm245_vm3, %v404_v4  ;;  %387 = vst.msk [vmem:[#allocation2 + $0x10] sm:$0xff] %vm245_vm3, %v383_v5 }
 0x1ff   : > { %v521_v7 = vpop.xlane.xlu1 %520  ;;  %v402_v9 = vpop.xlane.xlu0 %401 }
 0x200   : > { %v528_v10 = vadd.f32 %v521_v7, %v516_v8  ;;  %v405_v11 = vadd.f32 %v402_v9, %v390_v6 }
 0x201   : > { %v517_v13 = vld [vmem:[#allocation2 + $0x8] sm:$0xff]  ;;  %v534_v18 = vld [vmem:[#allocation3] sm:$0xff] }
 0x202   : > { %531 = vst.msk [vmem:[#allocation2] sm:$0xff] %vm245_vm3, %v528_v10  ;;  %408 = vst.msk [vmem:[#allocation3 + $0x10] sm:$0xff] %vm245_vm3, %v405_v11 }
 0x203   : > { %v524_v12 = vpop.xlane.xlu0 %523 }
 0x204   : > { %v529_v14 = vadd.f32 %v524_v12, %v517_v13 }
 0x205   : > { %v518_v16 = vld [vmem:[#allocation2 + $0x10] sm:$0xff]  ;;  %v535_v22 = vld [vmem:[#allocation3 + $0x8] sm:$0xff] }
 0x206   : > { %532 = vst.msk [vmem:[#allocation2 + $0x8] sm:$0xff] %vm245_vm3, %v529_v14 }
 0x207   : > { %v527_v15 = vpop.xlane.xlu1 %526  ;;  %v542_v17 = vpop.xlane.xlu0 %541 }
 0x208   : > { %v530_v19 = vadd.f32 %v527_v15, %v518_v16  ;;  %v549_v20 = vadd.f32 %v542_v17, %v534_v18 }
 0x209   : > { %v536_v24 = vld [vmem:[#allocation3 + $0x10] sm:$0xff] }
 0x20a   : > { %533 = vst.msk [vmem:[#allocation2 + $0x10] sm:$0xff] %vm245_vm3, %v530_v19  ;;  %552 = vst.msk [vmem:[#allocation3] sm:$0xff] %vm245_vm3, %v549_v20 }
 0x20b   : > { %v545_v21 = vpop.xlane.xlu1 %544  ;;  %v548_v23 = vpop.xlane.xlu0 %547 }
 0x20c   : > { %v550_v25 = vadd.f32 %v545_v21, %v535_v22  ;;  %v551_v26 = vadd.f32 %v548_v23, %v536_v24 }
 0x20e   : > { %553 = vst.msk [vmem:[#allocation3 + $0x8] sm:$0xff] %vm245_vm3, %v550_v25  ;;  %554 = vst.msk [vmem:[#allocation3 + $0x10] sm:$0xff] %vm245_vm3, %v551_v26 }
 0x20f PF: > { %p765_p5 = scmp.ne.s32.totalorder %s916_s15, 1 }
 0x210   : > { %v935_v29 = vmov (!%p765_p5), 0   ;;  %v585_v49 = vld [vmem:[%s1125_s2 + $0x10] sm:$0xff] (!%p765_p5)  ;;  %v583_v50 = vld [vmem:[%s1125_s2] sm:$0xff] (!%p765_p5)  ;;  %v584_v52 = vld [vmem:[%s1125_s2 + $0x8] sm:$0xff] (!%p765_p5)  ;;  %vm643_vm4 = vcmask (!%p765_p5), 130048  }
 0x211   : > { %558 = sbr.rel (%p765_p5) target bundleno = 696 (0x2b8), region = 48  ;;  %895 = vset.pattern.permute.xlu1 (!%p765_p5), %v935_v29  ;;  %894 = vset.pattern.permute.xlu0 (!%p765_p5), %v935_v29  ;;  %v559_v32 = vld [vmem:[#allocation2] sm:$0xff] (!%p765_p5)  ;;  %v560_v36 = vld [vmem:[#allocation2 + $0x8] sm:$0xff] (!%p765_p5)  ;;  %v591_v63 = vld [vmem:[%s1126_s3 + $0x10] sm:$0xff] (!%p765_p5) }
 0x212   : > { %v561_v27 = vld [vmem:[#allocation2 + $0x10] sm:$0xff] (!%p765_p5)  ;;  %v565_v33 = vld [vmem:[#allocation3] sm:$0xff] (!%p765_p5)  ;;  %v562_v34 = vmul.f32 (!%p765_p5), 0.03125, %v559_v32  ;;  %v563_v39 = vmul.f32 (!%p765_p5), 0.03125, %v560_v36  ;;  %v589_v58 = vld [vmem:[%s1126_s3] sm:$0xff] (!%p765_p5) }
 0x213   : > { %v564_v30 = vmul.f32 (!%p765_p5), 0.03125, %v561_v27  ;;  %v568_v35 = vmul.f32 (!%p765_p5), 0.03125, %v565_v33  ;;  %v590_v61 = vld [vmem:[%s1126_s3 + $0x8] sm:$0xff] (!%p765_p5)  ;;  %v601_v4 = vld [vmem:[#allocation4] sm:$0xff] (!%p765_p5)  ;;  %v603_v7 = vld [vmem:[#allocation4 + $0x10] sm:$0xff] (!%p765_p5) }
 0x214   : > { %v571_v41 = vmul.f32 (!%p765_p5), %v562_v34, %v562_v34  ;;  %v572_v43 = vmul.f32 (!%p765_p5), %v563_v39, %v563_v39  ;;  %v766_v5 = vld [vmem:[#allocation4 + $0x18] sm:$0xff] (!%p765_p5)  ;;  %v768_v8 = vld [vmem:[#allocation4 + $0x28] sm:$0xff] (!%p765_p5)  ;;  %v767_v12 = vld [vmem:[#allocation4 + $0x20] sm:$0xff] (!%p765_p5) }
 0x215   : > { %v567_v28 = vld [vmem:[#allocation3 + $0x10] sm:$0xff] (!%p765_p5)  ;;  %v566_v37 = vld [vmem:[#allocation3 + $0x8] sm:$0xff] (!%p765_p5)  ;;  %v573_v38 = vmul.f32 (!%p765_p5), %v564_v30, %v564_v30  ;;  %v602_v11 = vld [vmem:[#allocation4 + $0x8] sm:$0xff] (!%p765_p5) }
 0x216   : > { %v570_v31 = vmul.f32 (!%p765_p5), 0.03125, %v567_v28  ;;  %v569_v40 = vmul.f32 (!%p765_p5), 0.03125, %v566_v37  ;;  %v574_v44 = vsub.f32 (!%p765_p5), %v568_v35, %v571_v41 }
 0x218   : > { %v576_v42 = vsub.f32 %v570_v31, %v573_v38  ;;  %v575_v46 = vsub.f32 %v569_v40, %v572_v43  ;;  %v577_v47 = vadd.f32 1e-05, %v574_v44 }
 0x21a   : > { %v579_v45 = vadd.f32 1e-05, %v576_v42  ;;  %v578_v48 = vadd.f32 1e-05, %v575_v46 }
 0x21c   : > { %896 = vrsqrt.f32 %v579_v45 }
 0x21d   : > { %898 = vrsqrt.f32 %v577_v47 }
 0x21e   : > { %900 = vrsqrt.f32 %v578_v48 }
 0x226   : > { %v897_v51 = vpop.eup %896 }
 0x227   : > { %v899_v53 = vpop.eup %898  ;;  %v588_v54 = vmul.f32 %v897_v51, %v585_v49 }
 0x228   : > { %v901_v55 = vpop.eup %900  ;;  %v586_v56 = vmul.f32 %v899_v53, %v583_v50 }
 0x229   : > { %616 = vperm.xlu1 %895, %v588_v54   ;;  %v587_v57 = vmul.f32 %v901_v55, %v584_v52  ;;  %v594_v59 = vmul.f32 %v588_v54, %v564_v30 }
 0x22a   : > { %606 = vperm.xlu0 %894, %v586_v56   ;;  %v592_v60 = vmul.f32 %v586_v56, %v562_v34 }
 0x22b   : > { %v593_v62 = vmul.f32 %v587_v57, %v563_v39  ;;  %v597_v2 = vsub.f32 %v591_v63, %v594_v59 }
 0x22c   : > { %v595_v0 = vsub.f32 %v589_v58, %v592_v60 }
 0x22d   : > { %v596_v1 = vsub.f32 %v590_v61, %v593_v62 }
 0x22e   : > { %611 = vperm.xlu0 %894, %v587_v57   ;;  %624 = vperm.xlu1 %895, %v595_v0  }
 0x232   : > { %629 = vperm.xlu0 %894, %v596_v1   ;;  %634 = vperm.xlu1 %895, %v597_v2  }
 0x2a8   : > { %v617_v3 = vpop.permute.xlu1 %616 }
 0x2a9   : > { %v607_v6 = vpop.permute.xlu0 %606  ;;  %v621_v17 = vmul.f32 %v617_v3, %v603_v7  ;;  %v655_v18 = vmul.f32 %v768_v8, %v617_v3 }
 0x2aa   : > { %v619_v9 = vmul.f32 %v607_v6, %v601_v4  ;;  %v653_v10 = vmul.f32 %v766_v5, %v607_v6 }
 0x2ad   : > { %v612_v13 = vpop.permute.xlu0 %611  ;;  %v625_v14 = vpop.permute.xlu1 %624 }
 0x2ae   : > { %v637_v15 = vadd.f32 %v625_v14, %v619_v9  ;;  %v656_v16 = vadd.f32 %v653_v10, %v625_v14  ;;  %v620_v19 = vmul.f32 %v612_v13, %v602_v11  ;;  %v654_v20 = vmul.f32 %v767_v12, %v612_v13 }
 0x2b0   : > { %v640_v21 = vmax.f32 %v637_v15, 0.0  ;;  %v659_v22 = vmax.f32 %v656_v16, 0.0 }
 0x2b1   : > { %v630_v23 = vpop.permute.xlu0 %629  ;;  %v635_v24 = vpop.permute.xlu1 %634 }
 0x2b2   : > { %644 = vst.msk [vmem:[%s1127_s4] sm:$0xff] %vm643_vm4, %v640_v21  ;;  %769 = vst.msk [vmem:[%s1127_s4 + $0x18] sm:$0xff] %vm643_vm4, %v659_v22  ;;  %v638_v25 = vadd.f32 %v630_v23, %v620_v19  ;;  %v657_v26 = vadd.f32 %v654_v20, %v630_v23  ;;  %v639_v27 = vadd.f32 %v635_v24, %v621_v17 }
 0x2b3   : > { %v658_v28 = vadd.f32 %v655_v18, %v635_v24 }
 0x2b4   : > { %v641_v29 = vmax.f32 %v638_v25, 0.0  ;;  %v660_v30 = vmax.f32 %v657_v26, 0.0  ;;  %v642_v31 = vmax.f32 %v639_v27, 0.0 }
 0x2b5   : > { %v661_v32 = vmax.f32 %v658_v28, 0.0 }
 0x2b6   : > { %645 = vst.msk [vmem:[%s1127_s4 + $0x8] sm:$0xff] %vm643_vm4, %v641_v29  ;;  %770 = vst.msk [vmem:[%s1127_s4 + $0x20] sm:$0xff] %vm643_vm4, %v660_v30 }
 0x2b7   : > { %646 = vst.msk [vmem:[%s1127_s4 + $0x10] sm:$0xff] %vm643_vm4, %v642_v31  ;;  %771 = vst.msk [vmem:[%s1127_s4 + $0x28] sm:$0xff] %vm643_vm4, %v661_v32 }
 0x2b8 PF: > { %s14_s17 = sadd.s32 1, %s924_s17   ;;  %s1128_s15 = smov %s920_s16 }
 0x2b9   : > { %p11_p6 = scmp.ge.s32.totalorder %s14_s17, 4   ;;  %s1129_s16 = smov %s1131_s18 }
 0x2bb   :  { %13 = sbr.rel (!%p11_p6) target bundleno = 2 (0x2), region = 84 }

</bundles_post_ra>
